<compile_context>
chip_gen: v7x
topology: tpu7x:2x2x1
jax: 0.10.0
libtpu: 0.0.40
codegen_flags: <defaults>
</compile_context>

<pallas_src>
import functools

import jax
import jax.numpy as jnp
from jax import lax
from jax.experimental import pallas as pl
from jax.experimental.pallas import tpu as pltpu


def _round_up(x: int, m: int) -> int:
    return ((x + m - 1) // m) * m


def _surrogate_i_kernel(pred_ref, actual_ref, ps_ref, y_ref,
                        pmain_ref, psumy_ref,
                        *, y_pow, is_int_pow: bool, inv_phi: float):
    # Elementwise L1 loss (reduction='none')
    l1 = jnp.abs(pred_ref[...] - actual_ref[...])

    # Smooth indicator surrogate: 1 - exp(-l1/phi) + 0.05*l1   (exp -> EUP slot)
    smooth_i = 1.0 - jnp.exp(-l1 * inv_phi) + 0.05 * l1

    y = y_ref[...]
    if y_pow == 1:
        y_p = y
    elif is_int_pow:
        y_p = lax.integer_pow(y, int(y_pow))
    else:
        # TODO(synk): for non-integer y_pow with negative y the hoisted form
        # (y**p / mean**p) can differ (NaN) from PyTorch's (y/mean)**p when
        # y < 0 < y/mean; valid for the intended positive-outcome use case.
        y_p = jnp.power(y, jnp.float32(y_pow))

    # contribution before the global 1/mean(y)**y_pow scale (applied outside)
    contrib = smooth_i * (y_p / ps_ref[...])

    # Per-block partial sums: reduce only along the leading row-group axis so
    # the steady state is pure VPU vreg adds (no per-step cross-lane reduce).
    tm, c = contrib.shape
    pmain_ref[...] = contrib.reshape(tm // 8, 8, c).sum(axis=0)
    psumy_ref[...] = y.reshape(tm // 8, 8, c).sum(axis=0)


def surrogate_i_loss(pred, actual, ps, y, *, y_pow=1, phi: float = 3.0,
                     lanes: int = 512, block_rows: int = 128):
    """JAX/Pallas replica of my_loss_surrogate_I(y_pow, phi).forward(pred, actual, ps, y)."""
    pred = jnp.asarray(pred, jnp.float32).reshape(-1)
    actual = jnp.asarray(actual, jnp.float32).reshape(-1)
    ps = jnp.asarray(ps, jnp.float32).reshape(-1)
    y = jnp.asarray(y, jnp.float32).reshape(-1)
    assert pred.shape == actual.shape == ps.shape == y.shape, "inputs must share shape"

    numel = pred.size
    C = int(lanes)                                   # lane-dense width (multiple of 128)
    rows = -(-numel // C)
    tm = block_rows if rows >= block_rows else max(8, _round_up(rows, 8))
    padded_rows = _round_up(rows, tm)
    num_pad = padded_rows * C - numel
    grid = padded_rows // tm

    def prep(x, fill):
        if num_pad:
            x = jnp.pad(x, (0, num_pad), constant_values=fill)
        return x.reshape(padded_rows, C)

    pred_p = prep(pred, 0.0)     # l1 = 0 on padding
    actual_p = prep(actual, 0.0)
    ps_p = prep(ps, 1.0)         # safe divide on padding
    y_p = prep(y, 1.0)           # padded ones removed from sum(y) below

    is_int_pow = float(y_pow) == int(y_pow)
    kernel = functools.partial(
        _surrogate_i_kernel,
        y_pow=y_pow, is_int_pow=is_int_pow, inv_phi=1.0 / float(phi))

    n_elems = padded_rows * C
    cost = pl.CostEstimate(flops=10 * n_elems,
                           transcendentals=n_elems,
                           bytes_accessed=4 * n_elems * 4)

    pmain, psumy = pl.pallas_call(
        kernel,
        grid=(grid,),
        in_specs=[pl.BlockSpec((tm, C), lambda i: (i, 0)) for _ in range(4)],
        out_specs=[pl.BlockSpec((8, C), lambda i: (i, 0)) for _ in range(2)],
        out_shape=[jax.ShapeDtypeStruct((grid * 8, C), jnp.float32)
                   for _ in range(2)],
        compiler_params=pltpu.CompilerParams(
            dimension_semantics=("parallel",),        # distinct output block per step
            vmem_limit_bytes=32 * 1024 * 1024),
        cost_estimate=cost,
    )(pred_p, actual_p, ps_p, y_p)

    # Tiny epilogue outside the kernel (grid*8*C elements each).
    acc_main = jnp.sum(pmain)
    acc_y = jnp.sum(psumy) - jnp.float32(num_pad)     # remove padded 1.0s exactly
    inv_mean = jnp.float32(numel) / acc_y             # 1 / mean(y)
    if y_pow == 1:
        scale = inv_mean
    elif is_int_pow:
        scale = lax.integer_pow(inv_mean, int(y_pow))
    else:
        scale = inv_mean ** jnp.float32(y_pow)
    return acc_main * scale


def _reference(pred, actual, ps, y, *, y_pow=1, phi=3.0):
    l1 = jnp.abs(pred - actual)
    smooth_i = 1.0 - jnp.exp(-l1 / phi) + 0.05 * l1
    y_norm = (y / jnp.mean(y)) ** y_pow
    w = y_norm / ps
    return jnp.sum(smooth_i * w)


if __name__ == "__main__":
    key = jax.random.PRNGKey(0)
    k0, k1, k2, k3 = jax.random.split(key, 4)

    # Case 1: small shape, single grid block.
    N, D = 32, 64
    pred = jax.random.normal(k0, (N, D), dtype=jnp.float32)
    actual = jax.random.normal(k1, (N, D), dtype=jnp.float32)
    ps = jax.random.uniform(k2, (N, D), dtype=jnp.float32, minval=0.2, maxval=1.0)
    y = jax.random.uniform(k3, (N, D), dtype=jnp.float32, minval=0.1, maxval=2.0)

    out = jax.block_until_ready(surrogate_i_loss(pred, actual, ps, y, y_pow=1, phi=3.0))
    ref = _reference(pred, actual, ps, y, y_pow=1, phi=3.0)
    assert jnp.allclose(out, ref, rtol=1e-4, atol=1e-3), (out, ref)

    # Case 2: ragged shape exercising padding, grid > 1, and y_pow != 1.
    k4, k5, k6, k7 = jax.random.split(jax.random.PRNGKey(1), 4)
    N2, D2 = 300, 257
    pred2 = jax.random.normal(k4, (N2, D2), dtype=jnp.float32)
    actual2 = jax.random.normal(k5, (N2, D2), dtype=jnp.float32)
    ps2 = jax.random.uniform(k6, (N2, D2), dtype=jnp.float32, minval=0.2, maxval=1.0)
    y2 = jax.random.uniform(k7, (N2, D2), dtype=jnp.float32, minval=0.1, maxval=2.0)

    out2 = jax.block_until_ready(surrogate_i_loss(pred2, actual2, ps2, y2, y_pow=2, phi=3.0))
    ref2 = _reference(pred2, actual2, ps2, y2, y_pow=2, phi=3.0)
    assert jnp.allclose(out2, ref2, rtol=1e-3, atol=1e-2), (out2, ref2)

    print("KERNEL_OK")
</pallas_src>

<mosaic_0001>
module attributes {stable_mosaic.version = 11 : i64} {
  func.func @_surrogate_i_kernel(%arg0: i32, %arg1: memref<8x512xf32, #tpu.memory_space<vmem>>, %arg2: memref<8x512xf32, #tpu.memory_space<vmem>>, %arg3: memref<8x512xf32, #tpu.memory_space<vmem>>, %arg4: memref<8x512xf32, #tpu.memory_space<vmem>>, %arg5: memref<8x512xf32, #tpu.memory_space<vmem>>, %arg6: memref<8x512xf32, #tpu.memory_space<vmem>>) attributes {dimension_semantics = [#tpu.dimension_semantics<parallel>], iteration_bounds = array<i64: 1>, scalar_prefetch = 0 : i64, scratch_operands = 0 : i64, tpu.core_type = #tpu.core_type<tc>, window_params = [{transform_indices = @transform_0, window_bounds = array<i64: 8, 512>}, {transform_indices = @transform_1, window_bounds = array<i64: 8, 512>}, {transform_indices = @transform_2, window_bounds = array<i64: 8, 512>}, {transform_indices = @transform_3, window_bounds = array<i64: 8, 512>}, {transform_indices = @transform_4, window_bounds = array<i64: 8, 512>}, {transform_indices = @transform_5, window_bounds = array<i64: 8, 512>}]} {
    %c0 = arith.constant 0 : index
    %c0_0 = arith.constant 0 : index
    %0 = vector.load %arg1[%c0, %c0_0] : memref<8x512xf32, #tpu.memory_space<vmem>>, vector<8x512xf32>
    %c0_1 = arith.constant 0 : index
    %c0_2 = arith.constant 0 : index
    %1 = vector.load %arg2[%c0_1, %c0_2] : memref<8x512xf32, #tpu.memory_space<vmem>>, vector<8x512xf32>
    %2 = arith.subf %0, %1 : vector<8x512xf32>
    %3 = math.absf %2 : vector<8x512xf32>
    %cst = arith.constant 0.000000e+00 : f32
    %4 = vector.broadcast %cst : f32 to vector<8x512xf32>
    %5 = arith.subf %4, %3 : vector<8x512xf32>
    %cst_3 = arith.constant 0.333333343 : f32
    %6 = vector.broadcast %cst_3 : f32 to vector<8x512xf32>
    %7 = arith.mulf %5, %6 : vector<8x512xf32>
    %8 = math.exp %7 : vector<8x512xf32>
    %cst_4 = arith.constant 1.000000e+00 : f32
    %9 = vector.broadcast %cst_4 : f32 to vector<8x512xf32>
    %10 = arith.subf %9, %8 : vector<8x512xf32>
    %cst_5 = arith.constant 5.000000e-02 : f32
    %11 = vector.broadcast %cst_5 : f32 to vector<8x512xf32>
    %12 = arith.mulf %11, %3 : vector<8x512xf32>
    %13 = arith.addf %10, %12 : vector<8x512xf32>
    %c0_6 = arith.constant 0 : index
    %c0_7 = arith.constant 0 : index
    %14 = vector.load %arg4[%c0_6, %c0_7] : memref<8x512xf32, #tpu.memory_space<vmem>>, vector<8x512xf32>
    %c0_8 = arith.constant 0 : index
    %c0_9 = arith.constant 0 : index
    %15 = vector.load %arg3[%c0_8, %c0_9] : memref<8x512xf32, #tpu.memory_space<vmem>>, vector<8x512xf32>
    %16 = arith.divf %14, %15 : vector<8x512xf32>
    %17 = arith.mulf %13, %16 : vector<8x512xf32>
    %18 = vector.shape_cast %17 : vector<8x512xf32> to vector<1x8x512xf32>
    %cst_10 = arith.constant dense<0.000000e+00> : vector<8x512xf32>
    %19 = vector.multi_reduction <add>, %18, %cst_10 [0] : vector<1x8x512xf32> to vector<8x512xf32>
    %c0_11 = arith.constant 0 : index
    %c0_12 = arith.constant 0 : index
    %20 = vector.load %arg5[%c0_11, %c0_12] : memref<8x512xf32, #tpu.memory_space<vmem>>, vector<8x512xf32>
    tpu.vector_store %arg5[%c0_11, %c0_12], %19 {strides = array<i32>} : memref<8x512xf32, #tpu.memory_space<vmem>>, vector<8x512xf32>,
    %21 = vector.shape_cast %14 : vector<8x512xf32> to vector<1x8x512xf32>
    %cst_13 = arith.constant dense<0.000000e+00> : vector<8x512xf32>
    %22 = vector.multi_reduction <add>, %21, %cst_13 [0] : vector<1x8x512xf32> to vector<8x512xf32>
    %c0_14 = arith.constant 0 : index
    %c0_15 = arith.constant 0 : index
    %23 = vector.load %arg6[%c0_14, %c0_15] : memref<8x512xf32, #tpu.memory_space<vmem>>, vector<8x512xf32>
    tpu.vector_store %arg6[%c0_14, %c0_15], %22 {strides = array<i32>} : memref<8x512xf32, #tpu.memory_space<vmem>>, vector<8x512xf32>,
    return
  }
  func.func @transform_0(%arg0: i32) -> (i32, i32) {
    %c0_i32 = arith.constant 0 : i32
    %c0_i32_0 = arith.constant 0 : i32
    return %arg0, %c0_i32 : i32, i32
  }
  func.func @transform_1(%arg0: i32) -> (i32, i32) {
    %c0_i32 = arith.constant 0 : i32
    %c0_i32_0 = arith.constant 0 : i32
    return %arg0, %c0_i32 : i32, i32
  }
  func.func @transform_2(%arg0: i32) -> (i32, i32) {
    %c0_i32 = arith.constant 0 : i32
    %c0_i32_0 = arith.constant 0 : i32
    return %arg0, %c0_i32 : i32, i32
  }
  func.func @transform_3(%arg0: i32) -> (i32, i32) {
    %c0_i32 = arith.constant 0 : i32
    %c0_i32_0 = arith.constant 0 : i32
    return %arg0, %c0_i32 : i32, i32
  }
  func.func @transform_4(%arg0: i32) -> (i32, i32) {
    %c0_i32 = arith.constant 0 : i32
    %c0_i32_0 = arith.constant 0 : i32
    return %arg0, %c0_i32 : i32, i32
  }
  func.func @transform_5(%arg0: i32) -> (i32, i32) {
    %c0_i32 = arith.constant 0 : i32
    %c0_i32_0 = arith.constant 0 : i32
    return %arg0, %c0_i32 : i32, i32
  }
}

</mosaic_0001>

<bundles_post_ra>
// kernel: tpu_custom_call.1
= control target key start
LH: loop header
LB: loop body
LE: loop exit
PB: predicated region body
PF: predicated region fallthrough
CT: control target
= control target key end

     0   :  { %11 = vsyncpa [#allocation3], 0  ;;  %s467_s0 = inlined_call_operand.hbm [shape: f32[8,512], index: 0, kind: input, shape index: {}]   ;;  %s468_s1 = inlined_call_operand.hbm [shape: f32[8,512], index: 1, kind: input, shape index: {}]   ;;  %s469_s2 = inlined_call_operand.hbm [shape: f32[8,512], index: 2, kind: input, shape index: {}]   ;;  %s470_s3 = inlined_call_operand.hbm [shape: f32[8,512], index: 3, kind: input, shape index: {}]   ;;  %s471_s4 = inlined_call_operand.hbm [shape: f32[8,512], index: 4, kind: output, shape index: {0}]   ;;  %s472_s5 = inlined_call_operand.hbm [shape: f32[8,512], index: 5, kind: output, shape index: {1}]  }
   0x1   :  { %12 = vsyncpa [#allocation6], 0 }
   0x2   :  { %13 = vsyncpa [#allocation9], 0 }
   0x3   :  { %14 = vsyncpa [#allocation4], 0 }
   0x4   :  { %15 = vsyncpa [#allocation12], 0  ;;  %s343_s18 = smov [#allocation5]   ;;  %s344_s20 = smov [#allocation2]  }
   0x5   :  { %s32_s19 = sshll.u32 %s343_s18, 4  ;;  %s22_s21 = sshll.u32 %s344_s20, 4  ;;  %s33_s19 = int_to_ptr.vmem [resolvable:$true] %s32_s19  ;;  %s23_s21 = int_to_ptr.vmem [resolvable:$true] %s22_s21 }
   0x6   :  { %s201_s24 = scalar_lea.hbm %s468_s1, 512 }
   0x7   :  { %p202_p0 = scmp.ne.s32.totalorder %s468_s1, %s201_s24  ;;  %p205_p1 = scmp.lt.u32.totalorder %s201_s24, %s468_s1 }
   0x9   :  { %p207_p2 = pnand %p205_p1, %p202_p0 }
   0xb   :  { %210 = shalt.err (!%p207_p2)
}
   0xc   :  { %s211_s29 = scalar_lea.vmem %s33_s19, 512  ;;  %p216_p4 = scmp.lt.s32.totalorder %s33_s19, %s33_s19 }
   0xd   :  { %p212_p3 = scmp.ne.s32.totalorder %s33_s19, %s211_s29  ;;  %p217_p5 = scmp.lt.s32.totalorder %s211_s29, %s211_s29 }
   0xf   :  { %p218_p6 = por %p217_p5, %p216_p4 }
  0x11   :  { %p219_p7 = pnand %p218_p6, %p212_p3 }
  0x13   :  { %222 = shalt.err (!%p219_p7)
}
  0x14   :  { %35 = dma.hbm_to_vmem [thread:$0]  %s468_s1, 512, %s33_s19, [#allocation6]  }
  0x15   :  { %s223_s9 = scalar_lea.hbm %s467_s0, 512 }
  0x16   :  { %p224_p8 = scmp.ne.s32.totalorder %s467_s0, %s223_s9  ;;  %p227_p9 = scmp.lt.u32.totalorder %s223_s9, %s467_s0 }
  0x18   :  { %p229_p10 = pnand %p227_p9, %p224_p8 }
  0x1a   :  { %232 = shalt.err (!%p229_p10)
}
  0x1b   :  { %s233_s14 = scalar_lea.vmem %s23_s21, 512  ;;  %p238_p12 = scmp.lt.s32.totalorder %s23_s21, %s23_s21 }
  0x1c   :  { %p234_p11 = scmp.ne.s32.totalorder %s23_s21, %s233_s14  ;;  %p239_p13 = scmp.lt.s32.totalorder %s233_s14, %s233_s14 }
  0x1e   :  { %p240_p0 = por %p239_p13, %p238_p12 }
  0x20   :  { %p241_p1 = pnand %p240_p0, %p234_p11 }
  0x22   :  { %244 = shalt.err (!%p241_p1)
}
  0x23   :  { %25 = dma.hbm_to_vmem [thread:$0]  %s467_s0, 512, %s23_s21, [#allocation3]  }
  0x24   :  { %s345_s16 = smov [#allocation7]   ;;  %s346_s18 = smov [#allocation8]  }
  0x25   :  { %s42_s17 = sshll.u32 %s345_s16, 4  ;;  %s52_s19 = sshll.u32 %s346_s18, 4  ;;  %s43_s17 = int_to_ptr.vmem [resolvable:$true] %s42_s17  ;;  %s53_s19 = int_to_ptr.vmem [resolvable:$true] %s52_s19 }
  0x26   :  { %s245_s23 = scalar_lea.hbm %s469_s2, 512 }
  0x27   :  { %p246_p2 = scmp.ne.s32.totalorder %s469_s2, %s245_s23  ;;  %p249_p3 = scmp.lt.u32.totalorder %s245_s23, %s469_s2 }
  0x29   :  { %p251_p4 = pnand %p249_p3, %p246_p2 }
  0x2b   :  { %254 = shalt.err (!%p251_p4)
}
  0x2c   :  { %s255_s0 = scalar_lea.vmem %s43_s17, 512  ;;  %p260_p6 = scmp.lt.s32.totalorder %s43_s17, %s43_s17 }
  0x2d   :  { %p256_p5 = scmp.ne.s32.totalorder %s43_s17, %s255_s0  ;;  %p261_p7 = scmp.lt.s32.totalorder %s255_s0, %s255_s0 }
  0x2f   :  { %p262_p8 = por %p261_p7, %p260_p6 }
  0x31   :  { %p263_p9 = pnand %p262_p8, %p256_p5 }
  0x33   :  { %266 = shalt.err (!%p263_p9)
}
  0x34   :  { %45 = dma.hbm_to_vmem [thread:$0]  %s469_s2, 512, %s43_s17, [#allocation6]  }
  0x35   :  { %s267_s6 = scalar_lea.hbm %s470_s3, 512 }
  0x36   :  { %p268_p10 = scmp.ne.s32.totalorder %s470_s3, %s267_s6  ;;  %p271_p11 = scmp.lt.u32.totalorder %s267_s6, %s470_s3 }
  0x38   :  { %p273_p12 = pnand %p271_p11, %p268_p10 }
  0x3a   :  { %276 = shalt.err (!%p273_p12)
}
  0x3b   :  { %s277_s11 = scalar_lea.vmem %s53_s19, 512  ;;  %p282_p0 = scmp.lt.s32.totalorder %s53_s19, %s53_s19 }
  0x3c   :  { %p278_p13 = scmp.ne.s32.totalorder %s53_s19, %s277_s11  ;;  %p283_p1 = scmp.lt.s32.totalorder %s277_s11, %s277_s11 }
  0x3e   :  { %p284_p2 = por %p283_p1, %p282_p0 }
  0x40   :  { %p285_p3 = pnand %p284_p2, %p278_p13 }
  0x42   :  { %288 = shalt.err (!%p285_p3)
}
  0x43   :  { %55 = dma.hbm_to_vmem [thread:$0]  %s470_s3, 512, %s53_s19, [#allocation9]  }
  0x44   :  { %333 = dma.done.wait [#allocation3], 512  }
  0x45   :  { %334 = vsyncadd [#allocation3], 4294966784 }
  0x46   :  { %335 = dma.done.wait [#allocation6], 1024  }
  0x47   :  { %336 = vsyncadd [#allocation6], 4294966272 }
  0x48   :  { %337 = dma.done.wait [#allocation9], 512  }
  0x49   :  { %338 = vsyncadd [#allocation9], 4294966784  ;;  %v68_v0 = vld [vmem:[#allocation2] sm:$0xff]  ;;  %v69_v4 = vld [vmem:[#allocation2 + $0x8] sm:$0xff]  ;;  %s347_s13 = smov [#allocation11]  }
  0x4a   :  { %v72_v1 = vld [vmem:[#allocation5] sm:$0xff]  ;;  %v73_v5 = vld [vmem:[#allocation5 + $0x8] sm:$0xff]  ;;  %s164_s14 = sshll.u32 %s347_s13, 4  ;;  %v70_v8 = vld [vmem:[#allocation2 + $0x10] sm:$0xff]  ;;  %s165_s14 = int_to_ptr.vmem [resolvable:$true] %s164_s14 }
  0x4b   :  { %v427_v2 = vld [vmem:[#allocation8] sm:$0xff]  ;;  %v76_v3 = vsub.f32 %v68_v0, %v72_v1  ;;  %v77_v6 = vsub.f32 %v69_v4, %v73_v5  ;;  %v430_v7 = vld [vmem:[#allocation8 + $0x8] sm:$0xff]  ;;  %v74_v10 = vld [vmem:[#allocation5 + $0x10] sm:$0xff]  ;;  %s289_s3 = scalar_lea.vmem %s165_s14, 512  ;;  %p294_p5 = scmp.lt.s32.totalorder %s165_s14, %s165_s14 }
  0x4c   :  { %144 = vst [vmem:[#allocation11] sm:$0xff] %v427_v2  ;;  %145 = vst [vmem:[#allocation11 + $0x8] sm:$0xff] %v430_v7  ;;  %v433_v11 = vld [vmem:[#allocation8 + $0x10] sm:$0xff]  ;;  %v78_v13 = vsub.f32 %v70_v8, %v74_v10  ;;  %v71_v14 = vld [vmem:[#allocation2 + $0x18] sm:$0xff]  ;;  %p290_p4 = scmp.ne.s32.totalorder %s165_s14, %s289_s3  ;;  %p295_p6 = scmp.lt.s32.totalorder %s289_s3, %s289_s3 }
  0x4d   :  { %v80_v9 = vand.u32 2147483647, %v76_v3  ;;  %v81_v12 = vand.u32 2147483647, %v77_v6  ;;  %146 = vst [vmem:[#allocation11 + $0x10] sm:$0xff] %v433_v11  ;;  %v75_v15 = vld [vmem:[#allocation5 + $0x18] sm:$0xff] }
  0x4e   :  { %v436_v16 = vld [vmem:[#allocation8 + $0x18] sm:$0xff]  ;;  %v116_v18 = vld [vmem:[#allocation7] sm:$0xff]  ;;  %v79_v19 = vsub.f32 %v71_v14, %v75_v15  ;;  %v117_v21 = vld [vmem:[#allocation7 + $0x8] sm:$0xff]  ;;  %v82_v22 = vand.u32 2147483647, %v78_v13  ;;  %p296_p7 = por %p295_p6, %p294_p5 }
  0x4f   :  { %v84_v17 = vsub.f32 0.0, %v80_v9  ;;  %147 = vst [vmem:[#allocation11 + $0x18] sm:$0xff] %v436_v16  ;;  %v85_v20 = vsub.f32 0.0, %v81_v12  ;;  %v118_v23 = vld [vmem:[#allocation7 + $0x10] sm:$0xff] }
  0x50   :  { %v83_v25 = vand.u32 2147483647, %v79_v19  ;;  %p297_p8 = pnand %p296_p7, %p290_p4 }
  0x51   :  { %v88_v24 = vmul.f32 0.33333334, %v84_v17 }
  0x52   :  { %300 = shalt.err (!%p297_p8)
}
  0x53   :  { %s301_s16 = scalar_lea.hbm %s472_s5, 512 }
  0x54   :  { %p302_p9 = scmp.ne.s32.totalorder %s472_s5, %s301_s16  ;;  %p305_p10 = scmp.lt.u32.totalorder %s301_s16, %s472_s5 }
  0x56   :  { %p307_p11 = pnand %p305_p10, %p302_p9 }
  0x58   :  { %310 = shalt.err (!%p307_p11)
}
  0x59   :  { %167 = dma.vmem_to_hbm [thread:$0]  %s165_s14, 512, %s472_s5, [#allocation12]   ;;  %185 = vrcp.f32 %v116_v18  ;;  %v89_v26 = vmul.f32 0.33333334, %v85_v20  ;;  %v86_v27 = vsub.f32 0.0, %v82_v22  ;;  %v87_v29 = vsub.f32 0.0, %v83_v25 }
  0x5a   :  { %v92_v28 = vmul.f32 1.442695, %v88_v24  ;;  %187 = vrcp.f32 %v117_v21  ;;  %v119_v32 = vld [vmem:[#allocation7 + $0x18] sm:$0xff]  ;;  %v104_v39 = vmul.f32 0.05, %v80_v9  ;;  %s348_s5 = smov [#allocation10]  }
  0x5b   :  { %v94_v30 = vmul.f32 1.442695, %v89_v26  ;;  %v90_v31 = vmul.f32 0.33333334, %v86_v27  ;;  %189 = vrcp.f32 %v118_v23  ;;  %v91_v33 = vmul.f32 0.33333334, %v87_v29 }
  0x5c   :  { %191 = vpow2.f32 %v92_v28  ;;  %v105_v41 = vmul.f32 0.05, %v81_v12  ;;  %v106_v48 = vmul.f32 0.05, %v82_v22  ;;  %v107_v51 = vmul.f32 0.05, %v83_v25 }
  0x5d   :  { %193 = vpow2.f32 %v94_v30  ;;  %v96_v34 = vmul.f32 1.442695, %v90_v31  ;;  %v98_v35 = vmul.f32 1.442695, %v91_v33  ;;  %s154_s24 = sshll.u32 %s348_s5, 4  ;;  %s155_s24 = int_to_ptr.vmem [resolvable:$true] %s154_s24 }
  0x5e   :  { %195 = vrcp.f32 %v119_v32  ;;  %s311_s25 = scalar_lea.vmem %s155_s24, 512  ;;  %p316_p13 = scmp.lt.s32.totalorder %s155_s24, %s155_s24 }
  0x5f   :  { %197 = vpow2.f32 %v96_v34  ;;  %p312_p12 = scmp.ne.s32.totalorder %s155_s24, %s311_s25  ;;  %p317_p0 = scmp.lt.s32.totalorder %s311_s25, %s311_s25 }
  0x60   :  { %199 = vpow2.f32 %v98_v35 }
  0x61   :  { %p318_p1 = por %p317_p0, %p316_p13 }
  0x63   :  { %v186_v36 = vpop.eup %185  ;;  %p319_p2 = pnand %p318_p1, %p312_p12 }
  0x64   :  { %v188_v37 = vpop.eup %187  ;;  %v121_v44 = vmul.f32 %v186_v36, %v427_v2 }
  0x65   :  { %v190_v38 = vpop.eup %189  ;;  %v123_v47 = vmul.f32 %v188_v37, %v430_v7 }
  0x66   :  { %v192_v40 = vpop.eup %191  ;;  %v125_v55 = vmul.f32 %v190_v38, %v433_v11 }
  0x67   :  { %v194_v42 = vpop.eup %193  ;;  %v100_v43 = vsub.f32 1.0, %v192_v40 }
  0x68   :  { %v196_v45 = vpop.eup %195  ;;  %v101_v46 = vsub.f32 1.0, %v194_v42 }
  0x69   :  { %v198_v49 = vpop.eup %197  ;;  %v108_v50 = vadd.f32 %v104_v39, %v100_v43  ;;  %v127_v58 = vmul.f32 %v196_v45, %v436_v16 }
  0x6a   :  { %v200_v52 = vpop.eup %199  ;;  %v109_v53 = vadd.f32 %v105_v41, %v101_v46  ;;  %v102_v54 = vsub.f32 1.0, %v198_v49 }
  0x6b   :  { %v128_v56 = vmul.f32 %v121_v44, %v108_v50  ;;  %v103_v57 = vsub.f32 1.0, %v200_v52 }
  0x6c   :  { %v129_v59 = vmul.f32 %v123_v47, %v109_v53  ;;  %v110_v60 = vadd.f32 %v106_v48, %v102_v54 }
  0x6d   :  { %136 = vst [vmem:[#allocation10] sm:$0xff] %v128_v56  ;;  %v111_v61 = vadd.f32 %v107_v51, %v103_v57 }
  0x6e   :  { %137 = vst [vmem:[#allocation10 + $0x8] sm:$0xff] %v129_v59  ;;  %v130_v62 = vmul.f32 %v125_v55, %v110_v60 }
  0x6f   :  { %v131_v63 = vmul.f32 %v127_v58, %v111_v61 }
  0x70   :  { %138 = vst [vmem:[#allocation10 + $0x10] sm:$0xff] %v130_v62 }
  0x71   :  { %139 = vst [vmem:[#allocation10 + $0x18] sm:$0xff] %v131_v63 }
  0x72   :  { %322 = shalt.err (!%p319_p2)
}
  0x73   :  { %s323_s0 = scalar_lea.hbm %s471_s4, 512 }
  0x74   :  { %p324_p3 = scmp.ne.s32.totalorder %s471_s4, %s323_s0  ;;  %p327_p4 = scmp.lt.u32.totalorder %s323_s0, %s471_s4 }
  0x76   :  { %p329_p5 = pnand %p327_p4, %p324_p3 }
  0x78   :  { %332 = shalt.err (!%p329_p5)
}
  0x79   :  { %157 = dma.vmem_to_hbm [thread:$0]  %s155_s24, 512, %s471_s4, [#allocation4]  }
  0x7a   :  { %339 = dma.done.wait [#allocation4], 512  }
  0x7b   :  { %340 = vsyncadd [#allocation4], 4294966784 }
  0x7c   :  { %341 = dma.done.wait [#allocation12], 512  }
  0x7d   :  { %342 = vsyncadd [#allocation12], 4294966784 }
  0x7e   :  { %174 = vsyncpa [#allocation3], 1 }
  0x7f   :  { %175 = vsyncpa [#allocation6], 1 }
  0x80   :  { %176 = vsyncpa [#allocation9], 1 }
  0x81   :  { %177 = vsyncpa [#allocation4], 1 }
  0x82   :  { %178 = vsyncpa [#allocation12], 1 }

</bundles_post_ra>
